<compile_context>
chip_gen: v7x
topology: tpu7x:2x2x1
jax: 0.10.0
libtpu: 0.0.40
codegen_flags: <defaults>
</compile_context>

<pallas_src>
import jax
import jax.numpy as jnp
from jax.experimental import pallas as pl
from jax.experimental.pallas import tpu as pltpu

_LANE = 128        # vreg lane width
_SUBLANE = 8       # vreg sublane count (f32)
_TILE_B_MAX = 4096 # max batch rows per grid step (per-step VMEM ~20 MiB here)
_SPLIT_MIN_B = 1024  # below this, a single tile (no megacore benefit to split)


def _round_up(n, m):
    return ((n + m - 1) // m) * m


def _choose_tile_b(batch):
    """Fewest, largest tiles; >= 2 (even) grid steps once the batch is big
    enough that sharding across v7x's two TensorCores pays off."""
    b8 = _round_up(batch, _SUBLANE)
    if b8 <= _SPLIT_MIN_B:
        return b8
    n_tiles = max(2, pl.cdiv(b8, _TILE_B_MAX))
    if n_tiles % 2:
        n_tiles += 1  # even step count splits evenly across the 2 TCs
    return _round_up(pl.cdiv(b8, n_tiles), _SUBLANE)


def dqn_kernel(x_ref, w1_ref, b1_ref, w2_ref, b2_ref, q_ref, a_ref):
    # x_ref:  (TILE_B, in_states)    per-step batch tile
    # w1_ref: (in_states, H1_PAD)    resident in VMEM across the grid (const map)
    # b1_ref: (1, H1_PAD)
    # w2_ref: (H1_PAD, OUT_PAD)
    # b2_ref: (1, OUT_PAD)
    # q_ref:  (TILE_B, out_actions)  narrow Q writeback (no 128-lane padded slab)
    # a_ref:  (TILE_B, 1) int32      fused greedy action (first-max argmax)
    x = x_ref[...]
    w1 = w1_ref[...]
    in_states = x_ref.shape[1]
    out_actions = q_ref.shape[1]
    out_pad = w2_ref.shape[1]
    tile_b = x_ref.shape[0]

    # fc1 as a VPU outer product over the tiny contraction (K = in_states = 2):
    # two FMAs per output vreg instead of a mostly-padded MXU vmatmul.
    acc = x[:, 0:1] * w1[0:1, :]
    for k in range(1, in_states):
        acc = acc + x[:, k:k + 1] * w1[k:k + 1, :]
    h = jnp.maximum(acc + b1_ref[...], 0.0)  # ReLU, f32 on the VPU

    # fc2 on the MXU, fully lane-dense: (TILE_B, 128) @ (128, 128).
    q_full = jnp.dot(h, w2_ref[...], preferred_element_type=jnp.float32)
    q_full = q_full + b2_ref[...]

    # Narrow Q writeback: only the real action columns leave the kernel.
    q_ref[...] = q_full[:, :out_actions].astype(q_ref.dtype)

    # Fused greedy action. Padded action lanes hold Q == 0 (zero-padded w2/b2),
    # so mask them to -inf before the reduction (first-occurrence argmax).
    lane = jax.lax.broadcasted_iota(jnp.int32, (tile_b, out_pad), 1)
    q_m = jnp.where(lane < out_actions, q_full, -jnp.inf)
    row_max = jnp.max(q_m, axis=-1, keepdims=True)
    a_ref[...] = jnp.min(jnp.where(q_m == row_max, lane, out_pad),
                         axis=-1, keepdims=True)


def prepare_dqn_params(w1, b1, w2, b2):
    """One-time conversion of torch-layout params (out,in)/(out,) into the
    kernel's lane-dense resident layout. Call at init / target-net sync,
    NOT on every forward pass. (A second net can be packed into the spare
    hidden/action lanes of these same slabs to serve both nets per launch.)"""
    h1_nodes, in_states = w1.shape
    out_actions = w2.shape[0]
    h1_pad = _round_up(h1_nodes, _LANE)
    out_pad = _round_up(out_actions, _LANE)

    w1_t = jnp.zeros((in_states, h1_pad), w1.dtype).at[:, :h1_nodes].set(w1.T)
    b1_p = jnp.zeros((1, h1_pad), b1.dtype).at[:, :h1_nodes].set(b1.reshape(1, -1))
    # Zero-padded rows/cols of w2 kill any contribution from padded hidden units
    # and keep padded action lanes at exactly b2-pad = 0.
    w2_t = jnp.zeros((h1_pad, out_pad), w2.dtype).at[:h1_nodes, :out_actions].set(w2.T)
    b2_p = jnp.zeros((1, out_pad), b2.dtype).at[:, :out_actions].set(b2.reshape(1, -1))
    return w1_t, b1_p, w2_t, b2_p


def dqn_forward_with_greedy(x, w1_t, b1_p, w2_t, b2_p, out_actions):
    """x: (B, in_states) f32; prepared params from prepare_dqn_params.
       Returns (q, greedy): q is (B, out_actions) Q-values (same math as the
       PyTorch forward); greedy is the fused per-row argmax, (B,) int32."""
    B, in_states = x.shape
    h1_pad = w1_t.shape[1]
    out_pad = w2_t.shape[1]

    tile_b = _choose_tile_b(B)
    b_pad = _round_up(B, tile_b)
    if b_pad != B:
        x = jnp.pad(x, ((0, b_pad - B), (0, 0)))
    grid = (b_pad // tile_b,)

    const = lambda i: (0, 0)  # weights/biases: same block every step -> resident

    flops = 2 * b_pad * (in_states * h1_pad + h1_pad * out_pad)
    bytes_accessed = 4 * (b_pad * in_states
                          + w1_t.size + b1_p.size + w2_t.size + b2_p.size
                          + b_pad * out_actions + b_pad)

    q_pad, a_pad = pl.pallas_call(
        dqn_kernel,
        out_shape=(jax.ShapeDtypeStruct((b_pad, out_actions), x.dtype),
                   jax.ShapeDtypeStruct((b_pad, 1), jnp.int32)),
        grid=grid,
        in_specs=[
            pl.BlockSpec((tile_b, in_states), lambda i: (i, 0)),
            pl.BlockSpec((in_states, h1_pad), const),
            pl.BlockSpec((1, h1_pad), const),
            pl.BlockSpec((h1_pad, out_pad), const),
            pl.BlockSpec((1, out_pad), const),
        ],
        out_specs=[
            pl.BlockSpec((tile_b, out_actions), lambda i: (i, 0)),
            pl.BlockSpec((tile_b, 1), lambda i: (i, 0)),
        ],
        compiler_params=pltpu.CompilerParams(
            dimension_semantics=("parallel",),
            # x's (tile_b, 2) block is lane-padded ~64x in VMEM; raise the
            # scoped limit so 4096-row tiles clear v5e's 16 MiB default while
            # staying under v7x's 64 MiB physical VMEM.
            vmem_limit_bytes=48 * 1024 * 1024),
        cost_estimate=pl.CostEstimate(
            flops=flops, transcendentals=0, bytes_accessed=bytes_accessed),
    )(x, w1_t, b1_p, w2_t, b2_p)

    # Only padded batch rows are dropped here (cheap); no padded-lane slab.
    return q_pad[:B], a_pad[:B, 0]


def dqn_forward(x, w1_t, b1_p, w2_t, b2_p, out_actions):
    """Exactly the PyTorch DQN.forward semantics: returns (B, out_actions) Q."""
    return dqn_forward_with_greedy(x, w1_t, b1_p, w2_t, b2_p, out_actions)[0]


def init_dqn_params(key, in_states, h1_nodes, out_actions, dtype=jnp.float32):
    """Deterministic init mimicking torch.nn.Linear default U(-1/sqrt(fan_in), 1/sqrt(fan_in))."""
    k1, k2, k3, k4 = jax.random.split(key, 4)
    bound1 = 1.0 / jnp.sqrt(in_states)
    bound2 = 1.0 / jnp.sqrt(h1_nodes)
    w1 = jax.random.uniform(k1, (h1_nodes, in_states), dtype, -bound1, bound1)
    b1 = jax.random.uniform(k2, (h1_nodes,), dtype, -bound1, bound1)
    w2 = jax.random.uniform(k3, (out_actions, h1_nodes), dtype, -bound2, bound2)
    b2 = jax.random.uniform(k4, (out_actions,), dtype, -bound2, bound2)
    return w1, b1, w2, b2


if __name__ == "__main__":
    # MountainCar-v0: in_states=2 (position, velocity), out_actions=3.
    in_states, h1_nodes, out_actions = 2, 32, 3

    key = jax.random.PRNGKey(0)
    kx, kp = jax.random.split(key)
    w1, b1, w2, b2 = init_dqn_params(kp, in_states, h1_nodes, out_actions)

    # Hoisted, one-time param prep (layout plumbing out of the per-step path).
    w1_t, b1_p, w2_t, b2_p = prepare_dqn_params(w1, b1, w2, b2)

    ok = True
    # batch=50: odd batch (row padding, single tile); batch=2048: even 2-step grid.
    for batch in (50, 2048):
        x = jax.random.normal(jax.random.fold_in(kx, batch),
                              (batch, in_states), jnp.float32)
        q, greedy = dqn_forward_with_greedy(x, w1_t, b1_p, w2_t, b2_p, out_actions)
        jax.block_until_ready((q, greedy))

        # Reference check in plain JAX (same math as the PyTorch forward).
        ref = jnp.maximum(x @ w1.T + b1, 0.0) @ w2.T + b2
        ok &= q.shape == (batch, out_actions)
        ok &= bool(jnp.allclose(q, ref, atol=1e-5, rtol=1e-5))
        # Fused argmax must match argmax over the kernel's own Q-values.
        ok &= bool(jnp.array_equal(greedy,
                                   jnp.argmax(q, axis=-1).astype(jnp.int32)))

    if ok:
        print("KERNEL_OK")
</pallas_src>

<mosaic_0001>
module attributes {stable_mosaic.version = 11 : i64} {
  func.func @dqn_kernel(%arg0: i32, %arg1: memref<56x2xf32, #tpu.memory_space<vmem>>, %arg2: memref<2x128xf32, #tpu.memory_space<vmem>>, %arg3: memref<1x128xf32, #tpu.memory_space<vmem>>, %arg4: memref<128x128xf32, #tpu.memory_space<vmem>>, %arg5: memref<1x128xf32, #tpu.memory_space<vmem>>, %arg6: memref<56x3xf32, #tpu.memory_space<vmem>>, %arg7: memref<56x1xi32, #tpu.memory_space<vmem>>) attributes {dimension_semantics = [#tpu.dimension_semantics<parallel>], iteration_bounds = array<i64: 1>, scalar_prefetch = 0 : i64, scratch_operands = 0 : i64, tpu.core_type = #tpu.core_type<tc>, window_params = [{transform_indices = @transform_0, window_bounds = array<i64: 56, 2>}, {pipeline_mode = #tpu.pipeline_mode<synchronous>, transform_indices = @transform_1, window_bounds = array<i64: 2, 128>}, {pipeline_mode = #tpu.pipeline_mode<synchronous>, transform_indices = @transform_2, window_bounds = array<i64: 1, 128>}, {pipeline_mode = #tpu.pipeline_mode<synchronous>, transform_indices = @transform_3, window_bounds = array<i64: 128, 128>}, {pipeline_mode = #tpu.pipeline_mode<synchronous>, transform_indices = @transform_4, window_bounds = array<i64: 1, 128>}, {transform_indices = @transform_5, window_bounds = array<i64: 56, 3>}, {transform_indices = @transform_6, window_bounds = array<i64: 56, 1>}]} {
    %c0 = arith.constant 0 : index
    %c0_0 = arith.constant 0 : index
    %0 = vector.load %arg1[%c0, %c0_0] : memref<56x2xf32, #tpu.memory_space<vmem>>, vector<56x2xf32>
    %c0_1 = arith.constant 0 : index
    %c0_2 = arith.constant 0 : index
    %1 = vector.load %arg2[%c0_1, %c0_2] : memref<2x128xf32, #tpu.memory_space<vmem>>, vector<2x128xf32>
    %2 = vector.extract_strided_slice %0 {offsets = [0, 0], sizes = [56, 1], strides = [1, 1]} : vector<56x2xf32> to vector<56x1xf32>
    %3 = vector.extract_strided_slice %1 {offsets = [0, 0], sizes = [1, 128], strides = [1, 1]} : vector<2x128xf32> to vector<1x128xf32>
    %4 = vector.broadcast %2 : vector<56x1xf32> to vector<56x128xf32>
    %5 = vector.broadcast %3 : vector<1x128xf32> to vector<56x128xf32>
    %6 = arith.mulf %4, %5 : vector<56x128xf32>
    %7 = vector.extract_strided_slice %0 {offsets = [0, 1], sizes = [56, 1], strides = [1, 1]} : vector<56x2xf32> to vector<56x1xf32>
    %8 = vector.extract_strided_slice %1 {offsets = [1, 0], sizes = [1, 128], strides = [1, 1]} : vector<2x128xf32> to vector<1x128xf32>
    %9 = vector.broadcast %7 : vector<56x1xf32> to vector<56x128xf32>
    %10 = vector.broadcast %8 : vector<1x128xf32> to vector<56x128xf32>
    %11 = arith.mulf %9, %10 : vector<56x128xf32>
    %12 = arith.addf %6, %11 : vector<56x128xf32>
    %c0_3 = arith.constant 0 : index
    %c0_4 = arith.constant 0 : index
    %13 = vector.load %arg3[%c0_3, %c0_4] : memref<1x128xf32, #tpu.memory_space<vmem>>, vector<1x128xf32>
    %14 = vector.broadcast %13 : vector<1x128xf32> to vector<56x128xf32>
    %15 = arith.addf %12, %14 : vector<56x128xf32>
    %cst = arith.constant 0.000000e+00 : f32
    %16 = vector.broadcast %cst : f32 to vector<56x128xf32>
    %17 = arith.maximumf %15, %16 : vector<56x128xf32>
    %c0_5 = arith.constant 0 : index
    %c0_6 = arith.constant 0 : index
    %18 = vector.load %arg4[%c0_5, %c0_6] : memref<128x128xf32, #tpu.memory_space<vmem>>, vector<128x128xf32>
    %cst_7 = arith.constant dense<0.000000e+00> : vector<56x128xf32>
    %19 = tpu.matmul %17, %18, %cst_7 {dimension_numbers = #tpu.dot_dimension_numbers<[1], [0], [0], [1], [0, 0, 1, 1], [], []>} : vector<56x128xf32>, vector<128x128xf32>, vector<56x128xf32> -> vector<56x128xf32>
    %c0_8 = arith.constant 0 : index
    %c0_9 = arith.constant 0 : index
    %20 = vector.load %arg5[%c0_8, %c0_9] : memref<1x128xf32, #tpu.memory_space<vmem>>, vector<1x128xf32>
    %21 = vector.broadcast %20 : vector<1x128xf32> to vector<56x128xf32>
    %22 = arith.addf %19, %21 : vector<56x128xf32>
    %23 = vector.extract_strided_slice %22 {offsets = [0, 0], sizes = [56, 3], strides = [1, 1]} : vector<56x128xf32> to vector<56x3xf32>
    %c0_10 = arith.constant 0 : index
    %c0_11 = arith.constant 0 : index
    %24 = vector.load %arg6[%c0_10, %c0_11] : memref<56x3xf32, #tpu.memory_space<vmem>>, vector<56x3xf32>
    tpu.vector_store %arg6[%c0_10, %c0_11], %23 {strides = array<i32>} : memref<56x3xf32, #tpu.memory_space<vmem>>, vector<56x3xf32>,
    %25 = tpu.iota {dimensions = array<i32: 1>} : vector<56x128xi32>
    %c3_i32 = arith.constant 3 : i32
    %26 = vector.broadcast %c3_i32 : i32 to vector<56x128xi32>
    %27 = arith.cmpi slt, %25, %26 : vector<56x128xi32>
    %cst_12 = arith.constant 0xFF800000 : f32
    %28 = vector.broadcast %cst_12 : f32 to vector<56x128xf32>
    %29 = arith.select %27, %22, %28 : vector<56x128xi1>, vector<56x128xf32>
    %cst_13 = arith.constant dense<0xFF800000> : vector<56xf32>
    %30 = vector.multi_reduction <maximumf>, %29, %cst_13 [1] : vector<56x128xf32> to vector<56xf32>
    %31 = vector.shape_cast %30 : vector<56xf32> to vector<56x1xf32>
    %32 = vector.broadcast %31 : vector<56x1xf32> to vector<56x128xf32>
    %33 = arith.cmpf oeq, %29, %32 : vector<56x128xf32>
    %c128_i32 = arith.constant 128 : i32
    %34 = vector.broadcast %c128_i32 : i32 to vector<56x128xi32>
    %35 = arith.select %33, %25, %34 : vector<56x128xi1>, vector<56x128xi32>
    %cst_14 = arith.constant dense<2147483647> : vector<56xi32>
    %36 = vector.multi_reduction <minsi>, %35, %cst_14 [1] : vector<56x128xi32> to vector<56xi32>
    %37 = vector.shape_cast %36 : vector<56xi32> to vector<56x1xi32>
    %c0_15 = arith.constant 0 : index
    %c0_16 = arith.constant 0 : index
    %38 = vector.load %arg7[%c0_15, %c0_16] : memref<56x1xi32, #tpu.memory_space<vmem>>, vector<56x1xi32>
    tpu.vector_store %arg7[%c0_15, %c0_16], %37 {strides = array<i32>} : memref<56x1xi32, #tpu.memory_space<vmem>>, vector<56x1xi32>,
    return
  }
  func.func @transform_0(%arg0: i32) -> (i32, i32) {
    %c0_i32 = arith.constant 0 : i32
    %c0_i32_0 = arith.constant 0 : i32
    return %arg0, %c0_i32 : i32, i32
  }
  func.func @transform_1(%arg0: i32) -> (i32, i32) {
    %c0_i32 = arith.constant 0 : i32
    %c0_i32_0 = arith.constant 0 : i32
    %c0_i32_1 = arith.constant 0 : i32
    return %c0_i32, %c0_i32_0 : i32, i32
  }
  func.func @transform_2(%arg0: i32) -> (i32, i32) {
    %c0_i32 = arith.constant 0 : i32
    %c0_i32_0 = arith.constant 0 : i32
    %c0_i32_1 = arith.constant 0 : i32
    return %c0_i32, %c0_i32_0 : i32, i32
  }
  func.func @transform_3(%arg0: i32) -> (i32, i32) {
    %c0_i32 = arith.constant 0 : i32
    %c0_i32_0 = arith.constant 0 : i32
    %c0_i32_1 = arith.constant 0 : i32
    return %c0_i32, %c0_i32_0 : i32, i32
  }
  func.func @transform_4(%arg0: i32) -> (i32, i32) {
    %c0_i32 = arith.constant 0 : i32
    %c0_i32_0 = arith.constant 0 : i32
    %c0_i32_1 = arith.constant 0 : i32
    return %c0_i32, %c0_i32_0 : i32, i32
  }
  func.func @transform_5(%arg0: i32) -> (i32, i32) {
    %c0_i32 = arith.constant 0 : i32
    %c0_i32_0 = arith.constant 0 : i32
    return %arg0, %c0_i32 : i32, i32
  }
  func.func @transform_6(%arg0: i32) -> (i32, i32) {
    %c0_i32 = arith.constant 0 : i32
    %c0_i32_0 = arith.constant 0 : i32
    return %arg0, %c0_i32 : i32, i32
  }
}

</mosaic_0001>

<bundles_post_ra>
// kernel: tpu_custom_call.1
= control target key start
LH: loop header
LB: loop body
LE: loop exit
PB: predicated region body
PF: predicated region fallthrough
CT: control target
= control target key end

     0   :  { %12 = vsyncpa [#allocation3], 0  ;;  %s600_s21 = smov [#allocation2]   ;;  %s806_s0 = inlined_call_operand.vmem [shape: f32[56,2], index: 0, kind: input, shape index: {}]   ;;  %s807_s1 = inlined_call_operand.vmem [shape: f32[2,128], index: 1, kind: input, shape index: {}]   ;;  %s808_s2 = inlined_call_operand.vmem [shape: f32[1,128], index: 2, kind: input, shape index: {}]   ;;  %s809_s3 = inlined_call_operand.hbm [shape: f32[128,128], index: 3, kind: input, shape index: {}]   ;;  %s810_s4 = inlined_call_operand.vmem [shape: f32[1,128], index: 4, kind: input, shape index: {}]   ;;  %s811_s5 = inlined_call_operand.vmem [shape: f32[56,3], index: 5, kind: output, shape index: {0}]   ;;  %s812_s6 = inlined_call_operand.vmem [shape: s32[56,1], index: 6, kind: output, shape index: {1}]  }
   0x1   :  { %s24_s22 = sshll.u32 %s600_s21, 4  ;;  %s576_s25 = scalar_lea.hbm %s809_s3, 2048  ;;  %s25_s22 = int_to_ptr.vmem [resolvable:$true] %s24_s22 }
   0x2   :  { %p577_p0 = scmp.ne.s32.totalorder %s809_s3, %s576_s25  ;;  %p580_p1 = scmp.lt.u32.totalorder %s576_s25, %s809_s3 }
   0x4   :  { %p582_p2 = pnand %p580_p1, %p577_p0 }
   0x6   :  { %585 = shalt.err (!%p582_p2)
}
   0x7   :  { %s586_s30 = scalar_lea.vmem %s25_s22, 2048  ;;  %p591_p4 = scmp.lt.s32.totalorder %s25_s22, %s25_s22 }
   0x8   :  { %p587_p3 = scmp.ne.s32.totalorder %s25_s22, %s586_s30  ;;  %p592_p5 = scmp.lt.s32.totalorder %s586_s30, %s586_s30 }
   0xa   :  { %p593_p6 = por %p592_p5, %p591_p4 }
   0xc   :  { %p594_p7 = pnand %p593_p6, %p587_p3 }
   0xe   :  { %597 = shalt.err (!%p594_p7)
}
   0xf   :  { %s601_s7 = smov 128   ;;  %s602_s8 = smov 8  }
  0x10   :  { %30 = dma.hbm_to_vmem [thread:$0]  %s809_s3, 2048, %s25_s22, [#allocation3], %s601_s7, %s601_s7, %s602_s8  }
  0x11   :  { %598 = dma.done.wait [#allocation3], 2048  }
  0x12   :  { %599 = vsyncadd [#allocation3], 4294965248  ;;  %v603_v0 = vmov 1   ;;  %v604_v1 = vmov 0   ;;  %v605_v2 = vmov 0.0|0.0   ;;  %v37_v3 = vld [vmem:[%s806_s0 + $0x8] sm:$0xff]  ;;  %v79_v35 = vlaneseq }
  0x13   :  { %567 = vset.pattern.permute.xlu0 %v603_v0  ;;  %568 = vset.pattern.permute.xlu1 %v604_v1  ;;  %v36_v4 = vld [vmem:[%s806_s0] sm:$0xff]  ;;  %v158_v7 = vld [vmem:[#allocation2 + $0x8] sm:$0xff]  ;;  %v159_v9 = vld [vmem:[#allocation2 + $0x10] sm:$0xff]  ;;  %vm606_vm0 = vmmov 0   ;;  %v607_v19 = vmov 0.0   ;;  %vm280_vm1 = vcmask 23552  }
  0x14   :  { %543 = vmatprep.subr.bf16.mxu1 %v605_v2  ;;  %519 = vmatprep.subr.bf16.mxu0 %v605_v2  ;;  %v40_v5 = vld [vmem:[%s806_s0 + $0x20] sm:$0xff]  ;;  %v160_v10 = vld [vmem:[#allocation2 + $0x18] sm:$0xff]  ;;  %v162_v13 = vld [vmem:[#allocation2 + $0x28] sm:$0xff]  ;;  %v80_v36 = vshrl.u32 %v79_v35, 7 }
  0x15   :  { %51 = vperm.xlu1 %568, %v37_v3   ;;  %91 = vperm.xlu0 %567, %v36_v4   ;;  %v157_v6 = vld [vmem:[#allocation2] sm:$0xff]  ;;  %v523_v11 = vpack.c.bf16 %v160_v10, %v159_v9  ;;  %v41_v14 = vld [vmem:[%s806_s0 + $0x28] sm:$0xff]  ;;  %v38_v16 = vld [vmem:[%s806_s0 + $0x10] sm:$0xff] }
  0x16   :  { %v520_v8 = vpack.c.bf16 %v158_v7, %v157_v6  ;;  %v161_v12 = vld [vmem:[#allocation2 + $0x20] sm:$0xff]  ;;  %v163_v17 = vld [vmem:[#allocation2 + $0x30] sm:$0xff]  ;;  %v164_v18 = vld [vmem:[#allocation2 + $0x38] sm:$0xff]  ;;  %510 = vmatprep.mubr.msk.f32.mxu1 %vm606_vm0, %v607_v19  ;;  %498 = vmatprep.mubr.msk.f32.mxu0 %vm606_vm0, %v607_v19  ;;  %v120_v37 = vsub.s32 1, %v80_v36  ;;  %v81_v38 = vsub.s32 0, %v80_v36 }
  0x17   :  { %v526_v15 = vpack.c.bf16 %v162_v13, %v161_v12  ;;  %v39_v20 = vld [vmem:[%s806_s0 + $0x18] sm:$0xff]  ;;  %v529_v21 = vpack.c.bf16 %v164_v18, %v163_v17  ;;  %v165_v22 = vld [vmem:[#allocation2 + $0x40] sm:$0xff]  ;;  %v166_v23 = vld [vmem:[#allocation2 + $0x48] sm:$0xff] }
  0x18   :  { %551 = vmatpush3.bf16.msra.mxu1 %v520_v8  ;;  %521 = vmatpush3.bf16.msra.mxu0 %v520_v8  ;;  %v532_v24 = vpack.c.bf16 %v166_v23, %v165_v22  ;;  %v167_v25 = vld [vmem:[#allocation2 + $0x50] sm:$0xff]  ;;  %v168_v26 = vld [vmem:[#allocation2 + $0x58] sm:$0xff]  ;;  %v169_v28 = vld [vmem:[#allocation2 + $0x60] sm:$0xff] }
  0x19   :  { %66 = vperm.xlu1 %568, %v40_v5   ;;  %107 = vperm.xlu0 %567, %v40_v5   ;;  %v535_v27 = vpack.c.bf16 %v168_v26, %v167_v25  ;;  %v170_v29 = vld [vmem:[#allocation2 + $0x68] sm:$0xff]  ;;  %v42_v30 = vld [vmem:[%s806_s0 + $0x30] sm:$0xff]  ;;  %v172_v33 = vld [vmem:[#allocation2 + $0x78] sm:$0xff] }
  0x1a   :  { %544 = vmatprep.subr.bf16.mxu1 %v605_v2  ;;  %522 = vmatprep.subr.bf16.mxu0 %v605_v2  ;;  %v538_v31 = vpack.c.bf16 %v170_v29, %v169_v28  ;;  %v171_v32 = vld [vmem:[#allocation2 + $0x70] sm:$0xff]  ;;  %v43_v39 = vld [vmem:[%s807_s1] sm:$0x3]  ;;  %v723_v29 = vand.u32 127, %v79_v35 }
  0x1b   :  { %v541_v34 = vpack.c.bf16 %v172_v33, %v171_v32  ;;  %v121_v42 = vrot.slane %v43_v39, %v120_v37  ;;  %v82_v43 = vrot.slane %v43_v39, %v81_v38  ;;  %v441_v48 = vld [vmem:[%s808_s2] ss:$0 sm:$0xff] }
  0x1c   :  { %552 = vmatpush3.bf16.msra.mxu1 %v523_v11  ;;  %524 = vmatpush3.bf16.msra.mxu0 %v523_v11  ;;  %vm290_vm2 = vcmp.lt.s32.totalorder %v723_v29, 3 }
  0x1d   :  { %569 = vset.pattern.permute.xlu1 %v603_v0  ;;  %570 = vset.pattern.permute.xlu0 %v604_v1 }
  0x1e   :  { %95 = vperm.xlu1 %569, %v37_v3   ;;  %46 = vperm.xlu0 %570, %v36_v4  }
  0x1f   :  { %545 = vmatprep.subr.bf16.mxu1 %v605_v2  ;;  %525 = vmatprep.subr.bf16.mxu0 %v605_v2 }
  0x20   :  { %553 = vmatpush3.bf16.msra.mxu1 %v526_v15  ;;  %527 = vmatpush3.bf16.msra.mxu0 %v526_v15 }
  0x21   :  { %546 = vmatprep.subr.bf16.mxu1 %v605_v2  ;;  %528 = vmatprep.subr.bf16.mxu0 %v605_v2 }
  0x22   :  { %571 = vset.pattern.permute.xlu1 %v604_v1  ;;  %71 = vperm.xlu0 %570, %v41_v14  }
  0x23   :  { %56 = vperm.xlu1 %571, %v38_v16  }
  0x24   :  { %554 = vmatpush3.bf16.msra.mxu1 %v529_v21  ;;  %530 = vmatpush3.bf16.msra.mxu0 %v529_v21 }
  0x25   :  { %547 = vmatprep.subr.bf16.mxu1 %v605_v2  ;;  %531 = vmatprep.subr.bf16.mxu0 %v605_v2 }
  0x26   :  { %61 = vperm.xlu0 %570, %v39_v20  }
  0x27   :  { %572 = vset.pattern.permute.xlu1 %v603_v0 }
  0x28   :  { %99 = vperm.xlu1 %572, %v38_v16   ;;  %555 = vmatpush3.bf16.msra.mxu1 %v532_v24 }
  0x29   :  { %548 = vmatprep.subr.bf16.mxu1 %v605_v2  ;;  %533 = vmatpush3.bf16.msra.mxu0 %v532_v24 }
  0x2a   :  { %574 = vset.pattern.permute.xlu0 %v603_v0  ;;  %534 = vmatprep.subr.bf16.mxu0 %v605_v2 }
  0x2b   :  { %103 = vperm.xlu0 %574, %v39_v20  }
  0x2c   :  { %111 = vperm.xlu1 %572, %v41_v14   ;;  %556 = vmatpush3.bf16.msra.mxu1 %v535_v27 }
  0x2d   :  { %549 = vmatprep.subr.bf16.mxu1 %v605_v2  ;;  %536 = vmatpush3.bf16.msra.mxu0 %v535_v27 }
  0x2e   :  { %537 = vmatprep.subr.bf16.mxu0 %v605_v2 }
  0x30   :  { %573 = vset.pattern.permute.xlu1 %v604_v1  ;;  %557 = vmatpush3.bf16.msra.mxu1 %v538_v31 }
  0x31   :  { %76 = vperm.xlu1 %573, %v42_v30   ;;  %550 = vmatprep.subr.bf16.mxu1 %v605_v2 }
  0x32   :  { %539 = vmatpush3.bf16.msra.mxu0 %v538_v31 }
  0x33   :  { %540 = vmatprep.subr.bf16.mxu0 %v605_v2 }
  0x34   :  { %558 = vmatpush3.bf16.msra.mxu1 %v541_v34 }
  0x35   :  { %575 = vset.pattern.permute.xlu1 %v603_v0 }
  0x36   :  { %115 = vperm.xlu1 %575, %v42_v30   ;;  %542 = vmatpush3.bf16.msra.mxu0 %v541_v34  ;;  %v442_v30 = vld [vmem:[%s810_s4] ss:$0 sm:$0xff] }
  0x94   :  { %v52_v40 = vpop.permute.xlu1 %51  ;;  %v92_v41 = vpop.permute.xlu0 %91 }
  0x95   :  { %v84_v53 = vmul.f32 %v82_v43, %v52_v40  ;;  %v122_v54 = vmul.f32 %v121_v42, %v92_v41 }
  0x98   :  { %v67_v44 = vpop.permute.xlu1 %66  ;;  %v108_v45 = vpop.permute.xlu0 %107 }
  0x99   :  { %v87_v46 = vmul.f32 %v82_v43, %v67_v44  ;;  %v126_v47 = vmul.f32 %v121_v42, %v108_v45 }
  0x9b   :  { %v133_v49 = vadd.f32 %v126_v47, %v87_v46 }
  0x9d   :  { %v96_v50 = vpop.permute.xlu1 %95  ;;  %v47_v51 = vpop.permute.xlu0 %46  ;;  %v147_v52 = vadd.f32 %v441_v48, %v133_v49 }
  0x9e   :  { %v123_v55 = vmul.f32 %v121_v42, %v96_v50  ;;  %v83_v56 = vmul.f32 %v82_v43, %v47_v51 }
  0x9f   :  { %v154_v57 = vmax.f32 %v147_v52, 0.0 }
  0xa0   :  { %v130_v58 = vadd.f32 %v123_v55, %v84_v53  ;;  %v129_v59 = vadd.f32 %v122_v54, %v83_v56 }
  0xa1   :  { %511 = vmatmul.mubr.f32.vlgmr.msra.gmra.mrb[0].mxu1 %v154_v57  ;;  %v72_v60 = vpop.permute.xlu0 %71 }
  0xa2   :  { %v57_v61 = vpop.permute.xlu1 %56  ;;  %v143_v62 = vadd.f32 %v441_v48, %v129_v59  ;;  %513 = vmatprep.mubr.msk.f32.mxu1 %vm606_vm0, %v607_v19  ;;  %v144_v0 = vadd.f32 %v441_v48, %v130_v58  ;;  %v88_v11 = vmul.f32 %v82_v43, %v72_v60 }
  0xa3   :  { %v85_v3 = vmul.f32 %v82_v43, %v57_v61 }
  0xa4   :  { %v150_v63 = vmax.f32 %v143_v62, 0.0  ;;  %v151_v5 = vmax.f32 %v144_v0, 0.0 }
  0xa5   :  { %v62_v1 = vpop.permute.xlu0 %61 }
  0xa6   :  { %499 = vmatmul.mubr.f32.vlgmr.msra.gmra.mrb[0].mxu0 %v150_v63  ;;  %v86_v8 = vmul.f32 %v82_v43, %v62_v1 }
  0xa7   :  { %v100_v2 = vpop.permute.xlu1 %99  ;;  %501 = vmatprep.mubr.msk.f32.mxu0 %vm606_vm0, %v607_v19 }
  0xa8   :  { %v124_v4 = vmul.f32 %v121_v42, %v100_v2 }
  0xaa   :  { %v131_v6 = vadd.f32 %v124_v4, %v85_v3  ;;  %502 = vmatmul.mubr.f32.gmra.mrb[2].mxu0 %v151_v5  ;;  %v104_v7 = vpop.permute.xlu0 %103 }
  0xab   :  { %v125_v9 = vmul.f32 %v121_v42, %v104_v7  ;;  %v112_v10 = vpop.permute.xlu1 %111  ;;  %504 = vmatprep.mubr.msk.f32.mxu0 %vm606_vm0, %v607_v19 }
  0xac   :  { %v127_v12 = vmul.f32 %v121_v42, %v112_v10  ;;  %v145_v13 = vadd.f32 %v441_v48, %v131_v6 }
  0xad   :  { %v132_v14 = vadd.f32 %v125_v9, %v86_v8 }
  0xae   :  { %v134_v15 = vadd.f32 %v127_v12, %v88_v11  ;;  %v152_v16 = vmax.f32 %v145_v13, 0.0 }
  0xaf   :  { %v146_v17 = vadd.f32 %v441_v48, %v132_v14 }
  0xb0   :  { %v77_v18 = vpop.permute.xlu1 %76  ;;  %505 = vmatmul.mubr.f32.gmra.mrb[4].mxu0 %v152_v16  ;;  %v148_v20 = vadd.f32 %v441_v48, %v134_v15 }
  0xb1   :  { %507 = vmatprep.mubr.msk.f32.mxu0 %vm606_vm0, %v607_v19  ;;  %v153_v21 = vmax.f32 %v146_v17, 0.0  ;;  %v89_v24 = vmul.f32 %v82_v43, %v77_v18 }
  0xb2   :  { %v155_v22 = vmax.f32 %v148_v20, 0.0 }
  0xb4   :  { %508 = vmatmul.mubr.f32.gmra.mrb[6].mxu0 %v153_v21  ;;  %514 = vmatmul.mubr.f32.gmra.mrb[2].mxu1 %v155_v22 }
  0xb5   :  { %v116_v23 = vpop.permute.xlu1 %115  ;;  %516 = vmatprep.mubr.msk.f32.mxu1 %vm606_vm0, %v607_v19 }
  0xb6   :  { %v128_v25 = vmul.f32 %v121_v42, %v116_v23 }
  0xb8   :  { %v135_v26 = vadd.f32 %v128_v25, %v89_v24 }
  0xba   :  { %v149_v27 = vadd.f32 %v441_v48, %v135_v26 }
  0xbc   :  { %v156_v28 = vmax.f32 %v149_v27, 0.0 }
  0xbe   :  { %517 = vmatmul.mubr.f32.gmra.mrb[4].mxu1 %v156_v28 }
 0x174   :  { %v266_v31 = vpop.f32.mrb[0].mxu1 }
 0x175   :  { %v267_v32 = vadd.f32 %v442_v30, %v266_v31  ;;  %v512_v33 = vpop.f32.mrb[1].mxu1 }
 0x177   :  { %285 = vst.msk [vmem:[%s811_s5 + $0x20] sm:$0xff] %vm280_vm1, %v267_v32  ;;  %v295_v19 = vsel %vm290_vm2, %v267_v32, -inf }
 0x178   :  { %306 = vmax.xlane.f32.xlu0 %v295_v19 }
 0x179   :  { %v246_v34 = vpop.f32.mrb[0].mxu0 }
 0x17a   :  { %v247_v35 = vadd.f32 %v442_v30, %v246_v34  ;;  %v500_v36 = vpop.f32.mrb[1].mxu0 }
 0x17c   :  { %281 = vst.msk [vmem:[%s811_s5] sm:$0xff] %vm280_vm1, %v247_v35  ;;  %v291_v37 = vsel %vm290_vm2, %v247_v35, -inf }
 0x17d   :  { %298 = vmax.xlane.f32.xlu1 %v291_v37  ;;  %v251_v38 = vpop.f32.mrb[2].mxu0 }
 0x17e   :  { %v252_v39 = vadd.f32 %v442_v30, %v251_v38  ;;  %v503_v40 = vpop.f32.mrb[3].mxu0 }
 0x180   :  { %282 = vst.msk [vmem:[%s811_s5 + $0x8] sm:$0xff] %vm280_vm1, %v252_v39  ;;  %v292_v41 = vsel %vm290_vm2, %v252_v39, -inf }
 0x181   :  { %300 = vmax.xlane.f32.xlu0 %v292_v41 }
 0x183   :  { %v256_v42 = vpop.f32.mrb[4].mxu0 }
 0x184   :  { %v257_v43 = vadd.f32 %v442_v30, %v256_v42  ;;  %v506_v44 = vpop.f32.mrb[5].mxu0 }
 0x186   :  { %283 = vst.msk [vmem:[%s811_s5 + $0x10] sm:$0xff] %vm280_vm1, %v257_v43  ;;  %v293_v45 = vsel %vm290_vm2, %v257_v43, -inf }
 0x187   :  { %302 = vmax.xlane.f32.xlu0 %v293_v45  ;;  %v261_v46 = vpop.f32.mrb[6].mxu0  ;;  %v271_v47 = vpop.f32.mrb[2].mxu1 }
 0x188   :  { %v262_v48 = vadd.f32 %v442_v30, %v261_v46  ;;  %v272_v49 = vadd.f32 %v442_v30, %v271_v47  ;;  %v509_v50 = vpop.f32.mrb[7].mxu0  ;;  %v515_v51 = vpop.f32.mrb[3].mxu1 }
 0x18a   :  { %284 = vst.msk [vmem:[%s811_s5 + $0x18] sm:$0xff] %vm280_vm1, %v262_v48  ;;  %286 = vst.msk [vmem:[%s811_s5 + $0x28] sm:$0xff] %vm280_vm1, %v272_v49  ;;  %v294_v52 = vsel %vm290_vm2, %v262_v48, -inf  ;;  %v296_v53 = vsel %vm290_vm2, %v272_v49, -inf }
 0x18b   :  { %304 = vmax.xlane.f32.xlu1 %v294_v52 }
 0x18f   :  { %308 = vmax.xlane.f32.xlu1 %v296_v53 }
 0x191   :  { %v276_v54 = vpop.f32.mrb[4].mxu1 }
 0x192   :  { %v277_v55 = vadd.f32 %v442_v30, %v276_v54  ;;  %v518_v56 = vpop.f32.mrb[5].mxu1 }
 0x194   :  { %287 = vst.msk [vmem:[%s811_s5 + $0x30] sm:$0xff] %vm280_vm1, %v277_v55  ;;  %v297_v57 = vsel %vm290_vm2, %v277_v55, -inf  ;;  %vm424_vm1 = vcmask 7168  }
 0x195   :  { %310 = vmax.xlane.f32.xlu0 %v297_v57 }
 0x205   :  { %v307_v58 = vpop.xlane.xlu0 %306 }
 0x206   :  { %vm316_vm3 = vcmp.eq.f32.partialorder %v295_v19, %v307_v58 }
 0x207   :  { %v323_v60 = vsel %vm316_vm3, %v723_v29, 128 }
 0x208   :  { %v383_v1 = vshra.s32 %v323_v60, 16  ;;  %v382_v24 = vand.u32 65535, %v323_v60 }
 0x20a   :  { %v299_v59 = vpop.xlane.xlu1 %298  ;;  %v385_v4 = vcvt.s32.f32 %v383_v1  ;;  %v384_v32 = vcvt.s32.f32 %v382_v24 }
 0x20b   :  { %vm312_vm4 = vcmp.eq.f32.partialorder %v291_v37, %v299_v59 }
 0x20c   :  { %v319_v61 = vsel %vm312_vm4, %v723_v29, 128 }
 0x20d   :  { %v327_v62 = vshra.s32 %v319_v61, 16  ;;  %v326_v23 = vand.u32 65535, %v319_v61 }
 0x20e   :  { %v301_v63 = vpop.xlane.xlu0 %300 }
 0x20f   :  { %vm313_vm5 = vcmp.eq.f32.partialorder %v292_v41, %v301_v63  ;;  %v329_v0 = vcvt.s32.f32 %v327_v62  ;;  %v328_v27 = vcvt.s32.f32 %v326_v23 }
 0x210   :  { %v320_v2 = vsel %vm313_vm5, %v723_v29, 128 }
 0x211   :  { %330 = vmin.xlane.f32.xlu1 %v329_v0  ;;  %v341_v3 = vshra.s32 %v320_v2, 16  ;;  %v340_v25 = vand.u32 65535, %v320_v2 }
 0x213   :  { %v343_v5 = vcvt.s32.f32 %v341_v3  ;;  %v342_v33 = vcvt.s32.f32 %v340_v25 }
 0x214   :  { %v303_v6 = vpop.xlane.xlu0 %302 }
 0x215   :  { %vm314_vm6 = vcmp.eq.f32.partialorder %v293_v45, %v303_v6  ;;  %386 = vmin.xlane.f32.xlu1 %v385_v4  ;;  %344 = vmin.xlane.f32.xlu0 %v343_v5 }
 0x216   :  { %v321_v7 = vsel %vm314_vm6, %v723_v29, 128 }
 0x217   :  { %v355_v8 = vshra.s32 %v321_v7, 16  ;;  %v354_v19 = vand.u32 65535, %v321_v7 }
 0x218   :  { %v305_v9 = vpop.xlane.xlu1 %304 }
 0x219   :  { %vm315_vm7 = vcmp.eq.f32.partialorder %v294_v52, %v305_v9  ;;  %v357_v10 = vcvt.s32.f32 %v355_v8  ;;  %v356_v37 = vcvt.s32.f32 %v354_v19 }
 0x21a   :  { %v322_v11 = vsel %vm315_vm7, %v723_v29, 128 }
 0x21b   :  { %358 = vmin.xlane.f32.xlu1 %v357_v10  ;;  %v369_v12 = vshra.s32 %v322_v11, 16  ;;  %v368_v35 = vand.u32 65535, %v322_v11 }
 0x21c   :  { %v309_v13 = vpop.xlane.xlu1 %308 }
 0x21d   :  { %vm317_vm8 = vcmp.eq.f32.partialorder %v296_v53, %v309_v13  ;;  %v371_v14 = vcvt.s32.f32 %v369_v12  ;;  %v370_v41 = vcvt.s32.f32 %v368_v35 }
 0x21e   :  { %v324_v15 = vsel %vm317_vm8, %v723_v29, 128 }
 0x21f   :  { %372 = vmin.xlane.f32.xlu0 %v371_v14  ;;  %v397_v16 = vshra.s32 %v324_v15, 16  ;;  %v396_v39 = vand.u32 65535, %v324_v15 }
 0x221   :  { %v399_v17 = vcvt.s32.f32 %v397_v16  ;;  %v398_v44 = vcvt.s32.f32 %v396_v39 }
 0x222   :  { %v311_v18 = vpop.xlane.xlu0 %310 }
 0x223   :  { %vm318_vm9 = vcmp.eq.f32.partialorder %v297_v57, %v311_v18  ;;  %400 = vmin.xlane.f32.xlu0 %v399_v17 }
 0x224   :  { %v325_v20 = vsel %vm318_vm9, %v723_v29, 128 }
 0x225   :  { %v411_v21 = vshra.s32 %v325_v20, 16  ;;  %v410_v45 = vand.u32 65535, %v325_v20 }
 0x227   :  { %v413_v22 = vcvt.s32.f32 %v411_v21  ;;  %v412_v48 = vcvt.s32.f32 %v410_v45 }
 0x229   :  { %414 = vmin.xlane.f32.xlu1 %v413_v22 }
 0x29e   :  { %v331_v26 = vpop.xlane.xlu1 %330 }
 0x29f   :  { %vm332_vm10 = vcmp.eq.f32.partialorder %v329_v0, %v331_v26  ;;  %v337_v50 = vcvt.f32.s32 %v331_v26 }
 0x2a0   :  { %v333_v28 = vsel %vm332_vm10, %v328_v27, inf }
 0x2a1   :  { %334 = vmin.xlane.f32.xlu0 %v333_v28  ;;  %v338_v52 = vshll.u32 %v337_v50, 16 }
 0x2a2   :  { %v387_v30 = vpop.xlane.xlu1 %386  ;;  %v345_v31 = vpop.xlane.xlu0 %344 }
 0x2a3   :  { %vm388_vm11 = vcmp.eq.f32.partialorder %v385_v4, %v387_v30  ;;  %vm346_vm12 = vcmp.eq.f32.partialorder %v343_v5, %v345_v31  ;;  %v393_v53 = vcvt.f32.s32 %v387_v30  ;;  %v351_v54 = vcvt.f32.s32 %v345_v31 }
 0x2a4   :  { %v389_v34 = vsel %vm388_vm11, %v384_v32, inf  ;;  %v347_v29 = vsel %vm346_vm12, %v342_v33, inf }
 0x2a5   :  { %390 = vmin.xlane.f32.xlu0 %v389_v34  ;;  %348 = vmin.xlane.f32.xlu1 %v347_v29  ;;  %v394_v59 = vshll.u32 %v393_v53, 16  ;;  %v352_v60 = vshll.u32 %v351_v54, 16 }
 0x2a8   :  { %v359_v36 = vpop.xlane.xlu1 %358 }
 0x2a9   :  { %vm360_vm13 = vcmp.eq.f32.partialorder %v357_v10, %v359_v36  ;;  %v365_v63 = vcvt.f32.s32 %v359_v36 }
 0x2aa   :  { %v361_v38 = vsel %vm360_vm13, %v356_v37, inf }
 0x2ab   :  { %362 = vmin.xlane.f32.xlu0 %v361_v38  ;;  %v366_v3 = vshll.u32 %v365_v63, 16 }
 0x2ac   :  { %v373_v40 = vpop.xlane.xlu0 %372 }
 0x2ad   :  { %vm374_vm14 = vcmp.eq.f32.partialorder %v371_v14, %v373_v40  ;;  %v379_v4 = vcvt.f32.s32 %v373_v40 }
 0x2ae   :  { %v375_v42 = vsel %vm374_vm14, %v370_v41, inf }
 0x2af   :  { %376 = vmin.xlane.f32.xlu1 %v375_v42  ;;  %v380_v8 = vshll.u32 %v379_v4, 16 }
 0x2b0   :  { %v401_v43 = vpop.xlane.xlu0 %400 }
 0x2b1   :  { %vm402_vm15 = vcmp.eq.f32.partialorder %v399_v17, %v401_v43  ;;  %v407_v9 = vcvt.f32.s32 %v401_v43 }
 0x2b2   :  { %v403_v46 = vsel %vm402_vm15, %v398_v44, inf }
 0x2b3   :  { %404 = vmin.xlane.f32.xlu1 %v403_v46  ;;  %v408_v13 = vshll.u32 %v407_v9, 16 }
 0x2b6   :  { %v415_v47 = vpop.xlane.xlu1 %414 }
 0x2b7   :  { %vm416_vm0 = vcmp.eq.f32.partialorder %v413_v22, %v415_v47  ;;  %v421_v15 = vcvt.f32.s32 %v415_v47 }
 0x2b8   :  { %v417_v49 = vsel %vm416_vm0, %v412_v48, inf }
 0x2b9   :  { %418 = vmin.xlane.f32.xlu0 %v417_v49  ;;  %v422_v18 = vshll.u32 %v421_v15, 16 }
 0x32e   :  { %v335_v51 = vpop.xlane.xlu0 %334 }
 0x32f   :  { %v336_v55 = vcvt.f32.s32 %v335_v51 }
 0x331   :  { %v339_v56 = vadd.s32 %v338_v52, %v336_v55 }
 0x332   :  { %v349_v57 = vpop.xlane.xlu1 %348  ;;  %v391_v58 = vpop.xlane.xlu0 %390 }
 0x333   :  { %425 = vst.msk [vmem:[%s812_s6] sm:$0xff] %vm424_vm1, %v339_v56  ;;  %v350_v61 = vcvt.f32.s32 %v349_v57  ;;  %v392_v62 = vcvt.f32.s32 %v391_v58 }
 0x335   :  { %v353_v0 = vadd.s32 %v352_v60, %v350_v61  ;;  %v395_v1 = vadd.s32 %v394_v59, %v392_v62 }
 0x337   :  { %426 = vst.msk [vmem:[%s812_s6 + $0x8] sm:$0xff] %vm424_vm1, %v353_v0  ;;  %429 = vst.msk [vmem:[%s812_s6 + $0x20] sm:$0xff] %vm424_vm1, %v395_v1 }
 0x338   :  { %v363_v2 = vpop.xlane.xlu0 %362 }
 0x339   :  { %v364_v5 = vcvt.f32.s32 %v363_v2 }
 0x33b   :  { %v367_v6 = vadd.s32 %v366_v3, %v364_v5 }
 0x33c   :  { %v377_v7 = vpop.xlane.xlu1 %376 }
 0x33d   :  { %427 = vst.msk [vmem:[%s812_s6 + $0x10] sm:$0xff] %vm424_vm1, %v367_v6  ;;  %v378_v10 = vcvt.f32.s32 %v377_v7 }
 0x33f   :  { %v381_v11 = vadd.s32 %v380_v8, %v378_v10 }
 0x340   :  { %v405_v12 = vpop.xlane.xlu1 %404 }
 0x341   :  { %428 = vst.msk [vmem:[%s812_s6 + $0x18] sm:$0xff] %vm424_vm1, %v381_v11  ;;  %v406_v14 = vcvt.f32.s32 %v405_v12 }
 0x343   :  { %v409_v16 = vadd.s32 %v408_v13, %v406_v14 }
 0x345   :  { %430 = vst.msk [vmem:[%s812_s6 + $0x28] sm:$0xff] %vm424_vm1, %v409_v16 }
 0x346   :  { %v419_v17 = vpop.xlane.xlu0 %418 }
 0x347   :  { %v420_v20 = vcvt.f32.s32 %v419_v17 }
 0x349   :  { %v423_v21 = vadd.s32 %v422_v18, %v420_v20 }
 0x34b   :  { %431 = vst.msk [vmem:[%s812_s6 + $0x30] sm:$0xff] %vm424_vm1, %v423_v21 }
 0x34c   :  { %440 = vsyncpa [#allocation3], 1 }

</bundles_post_ra>
